<compile_context>
chip_gen: v7x
topology: tpu7x:2x2x1
jax: 0.10.0
libtpu: 0.0.40
codegen_flags: <defaults>
</compile_context>

<pallas_src>
import functools

import jax
import jax.numpy as jnp
from jax import lax
from jax.experimental import pallas as pl
from jax.experimental.pallas import tpu as pltpu

NORM_FACT = 10.0   # self._norm_fact = 10 (multiplicative, applied to the Q K^T scores)


def _vmem_limit(pipelined_bytes, scratch_bytes=0):
    """Per-kernel scoped-VMEM budget: double-buffered pipeline buffers + scratch,
    ~2x headroom for compiler-internal scratch, clamped to sane bounds."""
    need = 2 * pipelined_bytes + scratch_bytes          # BlockSpec double-buffers inputs/outputs
    return int(max(16 << 20, min(2 * need + (4 << 20), 100 << 20)))


# --------------------------------------------------------------------------- #
# Stage 1: K / V projection.  Q is projected inside the attention kernel so it
# never round-trips through HBM.
# --------------------------------------------------------------------------- #
def kv_proj_kernel(x_ref, w_ref, kv_ref):
    x = x_ref[...].astype(jnp.bfloat16)                       # (tm, D) bf16 MXU operand
    w = w_ref[...]                                            # (D, D)  bf16 (one chunk)
    # Single lane-dense (tm, D) store; no lane-dim slicing of a fused qkv result.
    kv_ref[...] = jnp.dot(x, w, preferred_element_type=jnp.float32).astype(kv_ref.dtype)


# --------------------------------------------------------------------------- #
# Stage 2: flash attention with fused Q projection; online softmax over ki.
# --------------------------------------------------------------------------- #
def flash_attn_kernel(x_ref, wq_ref, kv_ref, o_ref, q_ref, m_ref, l_ref,
                      *, approx_reciprocal):
    ki = pl.program_id(2)

    @pl.when(ki == 0)
    def _init():
        # Project this query tile once per (batch, q-tile); Wq already carries x10.
        xq = x_ref[...].astype(jnp.bfloat16)                  # (tq, D)
        q_ref[...] = jnp.dot(xq, wq_ref[...],
                             preferred_element_type=jnp.float32).astype(q_ref.dtype)
        m_ref[...] = jnp.full_like(m_ref, -jnp.inf)
        l_ref[...] = jnp.zeros_like(l_ref)
        o_ref[...] = jnp.zeros_like(o_ref)    # the f32 out block doubles as accumulator

    q = q_ref[...]           # (tq, D) bf16
    k = kv_ref[0]            # (tk, D) bf16
    v = kv_ref[1]            # (tk, D) bf16

    # scores = Q K^T : contract last dims directly (no explicit transpose / XLU).
    s = lax.dot_general(q, k, dimension_numbers=(((1,), (1,)), ((), ())),
                        preferred_element_type=jnp.float32)   # (tq, tk) f32

    m_prev = m_ref[...]
    m_new = jnp.maximum(m_prev, jnp.max(s, axis=-1, keepdims=True))
    alpha = jnp.exp(m_prev - m_new)                           # rescale of prior partials
    p = jnp.exp(s - m_new)                                    # softmax numerator (f32)
    # NOTE(v6e/v7x tuning): if the EUP saturates, exp can be done in bf16 here.
    l_ref[...] = alpha * l_ref[...] + jnp.sum(p, axis=-1, keepdims=True)
    o_ref[...] = alpha * o_ref[...] + jnp.dot(p.astype(v.dtype), v,
                                              preferred_element_type=jnp.float32)
    m_ref[...] = m_new

    @pl.when(ki == pl.num_programs(2) - 1)
    def _finalize():
        if approx_reciprocal:
            inv_l = pl.reciprocal(l_ref[...], approx=True)    # EUP slot, ~free; approximate
        else:
            inv_l = 1.0 / l_ref[...]
        o_ref[...] = (o_ref[...] * inv_l).astype(o_ref.dtype)


def attention_forward(x, wq, wk, wv, *, tile_q=512, tile_k=512, tile_m=512,
                      approx_reciprocal=True):
    """x: (B, N, D) f32; wq/wk/wv: (D, D) f32 stored as (in, out) = W.T of nn.Linear."""
    B, N, D = x.shape
    assert x.dtype == jnp.float32, "output block doubles as the f32 accumulator"
    tm = min(tile_m, N)
    tq = min(tile_q, N)
    tk = min(tile_k, N)
    assert N % tm == 0 and N % tq == 0 and N % tk == 0, "N must be divisible by tiles"

    # Fold the x10 norm factor into Wq; stack K/V weights so stage 1 streams one
    # (D, D) chunk at a time (no un-tiled (D, 3D) block held in VMEM).
    wq_scaled = (wq * NORM_FACT).astype(jnp.bfloat16)              # (D, D)
    w_kv = jnp.stack([wk, wv], axis=0).astype(jnp.bfloat16)        # (2, D, D)

    # ---- stage 1: fused K/V projection --------------------------------------
    s1_pipelined = tm * D * 4 + D * D * 2 + tm * D * 2
    kv = pl.pallas_call(
        kv_proj_kernel,
        out_shape=jax.ShapeDtypeStruct((B, 2, N, D), jnp.bfloat16),
        grid_spec=pltpu.PrefetchScalarGridSpec(
            num_scalar_prefetch=0,
            # chunk axis outer of the token-tile axis -> weight chunk stays resident.
            grid=(B, 2, N // tm),
            in_specs=[
                pl.BlockSpec((pl.Squeezed(), tm, D), lambda b, c, i: (b, i, 0)),
                pl.BlockSpec((pl.Squeezed(), D, D), lambda b, c, i: (c, 0, 0)),
            ],
            out_specs=pl.BlockSpec((pl.Squeezed(), pl.Squeezed(), tm, D),
                                   lambda b, c, i: (b, c, i, 0)),
        ),
        compiler_params=pltpu.CompilerParams(
            dimension_semantics=("parallel", "parallel", "parallel"),
            vmem_limit_bytes=_vmem_limit(s1_pipelined),
        ),
    )(x, w_kv)

    # ---- stage 2: flash attention with fused Q projection --------------------
    s2_pipelined = tq * D * 4 + D * D * 2 + 2 * tk * D * 2 + tq * D * 4
    s2_scratch = tq * D * 2 + 2 * tq * 4
    out = pl.pallas_call(
        functools.partial(flash_attn_kernel, approx_reciprocal=approx_reciprocal),
        out_shape=jax.ShapeDtypeStruct((B, N, D), x.dtype),
        grid_spec=pltpu.PrefetchScalarGridSpec(
            num_scalar_prefetch=0,
            grid=(B, N // tq, N // tk),
            in_specs=[
                pl.BlockSpec((pl.Squeezed(), tq, D), lambda b, qi, ki: (b, qi, 0)),
                pl.BlockSpec((D, D), lambda b, qi, ki: (0, 0)),
                # K and V arrive as one (2, tk, D) block of the fused kv tensor.
                # NOTE(v5e tuning): add pipeline_mode=pl.Buffered(3) here if DMA-exposed.
                pl.BlockSpec((pl.Squeezed(), 2, tk, D), lambda b, qi, ki: (b, 0, ki, 0)),
            ],
            out_specs=pl.BlockSpec((pl.Squeezed(), tq, D),
                                   lambda b, qi, ki: (b, qi, 0)),
            scratch_shapes=[
                pltpu.VMEM((tq, D), jnp.bfloat16),  # Q tile (persists across ki)
                pltpu.VMEM((tq, 1), jnp.float32),   # running max m
                pltpu.VMEM((tq, 1), jnp.float32),   # running denominator l
            ],
        ),
        compiler_params=pltpu.CompilerParams(
            dimension_semantics=("parallel", "parallel", "arbitrary"),
            vmem_limit_bytes=_vmem_limit(s2_pipelined, s2_scratch),
        ),
    )(x, wq_scaled, kv)
    return out


def reference_forward(x, wq, wk, wv):
    """Pure-JAX reference with identical semantics AND the same mixed-precision
    policy as the kernel (bf16 MXU operands, f32 accumulation, f32 softmax)."""
    bf = jnp.bfloat16
    xb = x.astype(bf)
    wqb = (wq * NORM_FACT).astype(bf)
    wkb = wk.astype(bf)
    wvb = wv.astype(bf)
    q = jnp.einsum("bnd,de->bne", xb, wqb,
                   preferred_element_type=jnp.float32).astype(bf)
    k = jnp.einsum("bnd,de->bne", xb, wkb,
                   preferred_element_type=jnp.float32).astype(bf)
    v = jnp.einsum("bnd,de->bne", xb, wvb,
                   preferred_element_type=jnp.float32).astype(bf)
    s = jnp.einsum("bnd,bmd->bnm", q, k, preferred_element_type=jnp.float32)
    attn = jax.nn.softmax(s, axis=-1)
    o = jnp.einsum("bnm,bmd->bnd", attn.astype(bf), v,
                   preferred_element_type=jnp.float32)
    return o.astype(x.dtype)


if __name__ == "__main__":
    def init_params(key, D):
        kq, kk, kv = jax.random.split(key, 3)
        scale = 1.0 / jnp.sqrt(jnp.float32(D))
        wq = jax.random.uniform(kq, (D, D), jnp.float32, -scale, scale)
        wk = jax.random.uniform(kk, (D, D), jnp.float32, -scale, scale)
        wv = jax.random.uniform(kv, (D, D), jnp.float32, -scale, scale)
        return wq, wk, wv

    root = jax.random.PRNGKey(0)
    k_small_x, k_small_w, k_big_x, k_big_w = jax.random.split(root, 4)

    # --- small shapes consistent with the module: batch=2, seq=8, hidden=32 ---
    B, N, D = 2, 8, 32
    x = jax.random.normal(k_small_x, (B, N, D), dtype=jnp.float32)
    wq, wk, wv = init_params(k_small_w, D)

    out = jax.block_until_ready(attention_forward(x, wq, wk, wv))
    ref = jax.block_until_ready(reference_forward(x, wq, wk, wv))
    assert out.shape == (B, N, D)
    err = float(jnp.max(jnp.abs(out - ref)))
    assert jnp.allclose(out, ref, atol=2e-2, rtol=2e-2), (
        "small-shape mismatch vs reference: max abs err = %g" % err)

    # --- larger shape exercising the real (8,128) tiling and multi-step kv axis ---
    B2, N2, D2 = 2, 1024, 128
    x2 = 0.1 * jax.random.normal(k_big_x, (B2, N2, D2), dtype=jnp.float32)
    wq2, wk2, wv2 = init_params(k_big_w, D2)

    out2 = jax.block_until_ready(attention_forward(x2, wq2, wk2, wv2))
    ref2 = jax.block_until_ready(reference_forward(x2, wq2, wk2, wv2))
    assert out2.shape == (B2, N2, D2)
    err2 = float(jnp.max(jnp.abs(out2 - ref2)))
    assert jnp.allclose(out2, ref2, atol=2e-2, rtol=2e-2), (
        "large-shape mismatch vs reference: max abs err = %g" % err2)

    # TODO(synk): proj_drop (nn.Dropout(p=0.0)) is an identity and is omitted.
    print("KERNEL_OK")
</pallas_src>

<mosaic_0001>
module attributes {stable_mosaic.version = 11 : i64} {
  func.func @kv_proj_kernel(%arg0: i32, %arg1: i32, %arg2: i32, %arg3: memref<1x8x32xf32, #tpu.memory_space<vmem>>, %arg4: memref<1x32x32xbf16, #tpu.memory_space<vmem>>, %arg5: memref<1x1x8x32xbf16, #tpu.memory_space<vmem>>) attributes {dimension_semantics = [#tpu.dimension_semantics<parallel>, #tpu.dimension_semantics<parallel>, #tpu.dimension_semantics<parallel>], iteration_bounds = array<i64: 2, 2, 1>, scalar_prefetch = 0 : i64, scratch_operands = 0 : i64, tpu.core_type = #tpu.core_type<tc>, window_params = [{transform_indices = @transform_0, window_bounds = array<i64: 1, 8, 32>}, {transform_indices = @transform_1, window_bounds = array<i64: 1, 32, 32>}, {transform_indices = @transform_2, window_bounds = array<i64: 1, 1, 8, 32>}]} {
    %c0 = arith.constant 0 : index
    %c0_0 = arith.constant 0 : index
    %c0_1 = arith.constant 0 : index
    %0 = vector.load %arg3[%c0, %c0_0, %c0_1] : memref<1x8x32xf32, #tpu.memory_space<vmem>>, vector<1x8x32xf32>
    %1 = vector.shape_cast %0 : vector<1x8x32xf32> to vector<8x32xf32>
    %2 = arith.truncf %1 : vector<8x32xf32> to vector<8x32xbf16>
    %c0_2 = arith.constant 0 : index
    %c0_3 = arith.constant 0 : index
    %c0_4 = arith.constant 0 : index
    %3 = vector.load %arg4[%c0_2, %c0_3, %c0_4] : memref<1x32x32xbf16, #tpu.memory_space<vmem>>, vector<1x32x32xbf16>
    %4 = vector.shape_cast %3 : vector<1x32x32xbf16> to vector<32x32xbf16>
    %cst = arith.constant dense<0.000000e+00> : vector<8x32xf32>
    %5 = tpu.matmul %2, %4, %cst {dimension_numbers = #tpu.dot_dimension_numbers<[1], [0], [0], [1], [0, 0, 1, 1], [], []>} : vector<8x32xbf16>, vector<32x32xbf16>, vector<8x32xf32> -> vector<8x32xf32>
    %6 = arith.truncf %5 : vector<8x32xf32> to vector<8x32xbf16>
    %c0_5 = arith.constant 0 : index
    %c0_6 = arith.constant 0 : index
    %c0_7 = arith.constant 0 : index
    %c0_8 = arith.constant 0 : index
    %7 = vector.load %arg5[%c0_5, %c0_6, %c0_7, %c0_8] : memref<1x1x8x32xbf16, #tpu.memory_space<vmem>>, vector<1x1x8x32xbf16>
    %8 = vector.shape_cast %7 : vector<1x1x8x32xbf16> to vector<8x32xbf16>
    %9 = vector.shape_cast %6 : vector<8x32xbf16> to vector<1x1x8x32xbf16>
    tpu.vector_store %arg5[%c0_5, %c0_6, %c0_7, %c0_8], %9 {strides = array<i32>} : memref<1x1x8x32xbf16, #tpu.memory_space<vmem>>, vector<1x1x8x32xbf16>,
    return
  }
  func.func @transform_0(%arg0: i32, %arg1: i32, %arg2: i32) -> (i32, i32, i32) {
    %c0_i32 = arith.constant 0 : i32
    %c0_i32_0 = arith.constant 0 : i32
    return %arg0, %arg2, %c0_i32 : i32, i32, i32
  }
  func.func @transform_1(%arg0: i32, %arg1: i32, %arg2: i32) -> (i32, i32, i32) {
    %c0_i32 = arith.constant 0 : i32
    %c0_i32_0 = arith.constant 0 : i32
    %c0_i32_1 = arith.constant 0 : i32
    return %arg1, %c0_i32, %c0_i32_0 : i32, i32, i32
  }
  func.func @transform_2(%arg0: i32, %arg1: i32, %arg2: i32) -> (i32, i32, i32, i32) {
    %c0_i32 = arith.constant 0 : i32
    %c0_i32_0 = arith.constant 0 : i32
    return %arg0, %arg1, %arg2, %c0_i32 : i32, i32, i32, i32
  }
}

</mosaic_0001>

<bundles_post_ra>
// kernel: tpu_custom_call.1
= control target key start
LH: loop header
LB: loop body
LE: loop exit
PB: predicated region body
PF: predicated region fallthrough
CT: control target
= control target key end

     0   :  { %s1140_s0 = inlined_call_operand.hbm [shape: f32[2,8,32], index: 0, kind: input, shape index: {}]   ;;  %s1141_s1 = inlined_call_operand.hbm [shape: bf16[2,32,32], index: 1, kind: input, shape index: {}]   ;;  %s1142_s2 = inlined_call_operand.hbm [shape: bf16[2,2,8,32], index: 2, kind: output, shape index: {}]  }
   0x1   :  { %1154 = sst [smem:[#allocation17_spill]] %s1140_s0 }
   0x2   :  { %1155 = sst [smem:[#allocation18_spill]] %s1142_s2 }
   0x3   :  { %7 = vsyncpa [#allocation3], 0 }
   0x4   :  { %9 = vsyncpa [#allocation3 + $0x1], 0 }
   0x5   :  { %10 = vsyncpa [#allocation6], 0 }
   0x6   :  { %12 = vsyncpa [#allocation6 + $0x1], 0 }
   0x7   :  { %13 = vsyncpa [#allocation4], 0 }
   0x8   :  { %15 = vsyncpa [#allocation4 + $0x1], 0  ;;  %s823_s9 = smov 0   ;;  %s825_s10 = smov 0  }
   0x9   :  { %s827_s11 = smov 0   ;;  %s829_s12 = smov 0  }
   0xa   :  { %s831_s13 = smov 0   ;;  %s833_s14 = smov 0  }
   0xb   :  { %s835_s15 = smov 0   ;;  %s837_s16 = smov 0  }
   0xc   :  { %s839_s17 = smov 0   ;;  %s841_s18 = smov 0  }
   0xd   :  { %s843_s19 = smov 0   ;;  %s845_s20 = smov 0  }
   0xe   :  { %s847_s21 = smov 0   ;;  %s849_s22 = smov 0  }
   0xf LB: > { %1156 = sst [smem:[#allocation11_spill]] %s747_s9  ;;  %s419_s23 = sadd.s32 4294967295, %s799_s22   ;;  %s799_s22 = sphi %s849_s22, %s21_s22   ;;  %s795_s21 = sphi %s847_s21, %s1187_s21   ;;  %s791_s20 = sphi %s845_s20, %s1200_s20   ;;  %s787_s19 = sphi %s843_s19, %s1199_s19   ;;  %s783_s18 = sphi %s841_s18, %s1198_s18   ;;  %s779_s17 = sphi %s839_s17, %s1197_s17   ;;  %s775_s16 = sphi %s837_s16, %s1196_s16   ;;  %s771_s15 = sphi %s835_s15, %s1195_s15   ;;  %s767_s14 = sphi %s833_s14, %s1194_s14   ;;  %s763_s13 = sphi %s831_s13, %s1193_s13   ;;  %s759_s12 = sphi %s829_s12, %s1192_s12   ;;  %s755_s11 = sphi %s827_s11, %s1191_s11   ;;  %s751_s10 = sphi %s825_s10, %s1190_s10   ;;  %s747_s9 = sphi %s823_s9, %s1189_s9  }
  0x10   : > { %1157 = sst [smem:[#allocation12_spill]] %s795_s21  ;;  %s40_s24 = sadd.s32 1, %s795_s21 }
  0x11   : > { %1158 = sst [smem:[#allocation13_spill]] %s799_s22  ;;  %p56_p0 = scmp.ne.s32.totalorder %s779_s17, %s775_s16 }
  0x12   : > { %p57_p1 = scmp.eq.s32.totalorder %s799_s22, 0  ;;  %p62_p2 = scmp.ne.s32.totalorder %s775_s16, %s771_s15 }
  0x13   : > { %p63_p3 = scmp.eq.s32.totalorder %s419_s23, 0  ;;  %p82_p4 = scmp.ne.s32.totalorder %s767_s14, %s763_s13 }
  0x14   : > { %p898_p5 = por %p57_p1, %p56_p0  ;;  %p88_p6 = scmp.ne.s32.totalorder %s763_s13, %s759_s12 }
  0x15   : > { %p903_p7 = por %p63_p3, %p62_p2  ;;  %p84_p8 = por %p82_p4, %p57_p1 }
  0x16   : > { %p907_p9 = por %p88_p6, %p63_p3  ;;  %p911_p10 = scmp.eq.s32.totalorder %s419_s23, 3 }
  0x17   : > { %s1160_s27 = scalar_select %p903_p7, 1, 0 }
  0x18   : > { %s1161_s28 = scalar_select %p907_p9, 1, 0 }
  0x19   : > { %p469_p11 = scmp.lt.s32.totalorder %s799_s22, 4  ;;  %s142_s30 = sand.u32 1, %s779_s17  }
  0x1a   : > { %s424_s3 = sshll.u32 %s795_s21, 7  ;;  %s423_s4 = sshll.u32 %s142_s30, 3 }
  0x1b   : > { %s1163_s0 = sld [smem:[#allocation17_spill]]  ;;  %s146_s8 = scalar_lea.vmem [#allocation2], %s423_s4 }
  0x1c   : > { %s154_s12 = sshll.u32 %s146_s8, 4  ;;  %p925_p12 = pnand %p469_p11, %p898_p5  ;;  %s929_s12 = int_to_ptr.vmem [resolvable:$true] %s154_s12 }
  0x1d   : > { %p931_p13 = pnand %p469_p11, %p84_p8 }
  0x1e   : > { %p591_p2 = pneg %p925_p12 }
  0x1f   : > { %s1165_s23 = scalar_select %p931_p13, 1, 0 }
  0x21   : > { %s921_s7 = scalar_lea.hbm %s1163_s0, %s424_s3  ;;  %s143_s3 = scalar_lea.sflag [#allocation3], %s142_s30 }
  0x22   : > { %s589_s5 = scalar_lea.hbm %s921_s7, 128  ;;  %s594_s6 = scalar_lea.hbm %s1163_s0, 256 }
  0x23   : > { %p590_p1 = scmp.ne.s32.totalorder %s921_s7, %s589_s5  ;;  %p595_p5 = scmp.lt.u32.totalorder %s921_s7, %s1163_s0 }
  0x24   : > { %p596_p6 = scmp.lt.u32.totalorder %s594_s6, %s589_s5  ;;  %p598_p11 = scmp.lt.u32.totalorder %s589_s5, %s921_s7 }
  0x25   : > { %p592_p3 = pnand %p591_p2, %p590_p1 }
  0x26   : > { %p597_p8 = por %p596_p6, %p595_p5 }
  0x27   : > { %p593_p4 = pneg %p592_p3 }
  0x28   : > { %p599_p0 = por %p598_p11, %p597_p8 }
  0x2a   : > { %p600_p9 = pnand %p599_p0, %p593_p4 }
  0x2c   : > { %603 = shalt.err (!%p600_p9)
}
  0x2d   : > { %s604_s30 = scalar_lea.vmem %s929_s12, 128  ;;  %s801_s26 = smov [#allocation2]  }
  0x2e   : > { %p605_p1 = scmp.ne.s32.totalorder %s929_s12, %s604_s30  ;;  %s609_s4 = sshll.u32 %s801_s26, 4  ;;  %s610_s4 = int_to_ptr.vmem [resolvable:$false] %s609_s4 }
  0x2f   : > { %s611_s25 = scalar_lea.vmem %s610_s4, 256  ;;  %p612_p13 = scmp.lt.s32.totalorder %s929_s12, %s610_s4 }
  0x30   : > { %p607_p3 = pnand %p605_p1, %p591_p2  ;;  %p613_p5 = scmp.lt.s32.totalorder %s611_s25, %s604_s30 }
  0x32   : > { %p608_p7 = pneg %p607_p3  ;;  %p614_p6 = por %p613_p5, %p612_p13 }
  0x34   : > { %p615_p8 = pnand %p614_p6, %p608_p7 }
  0x36   : > { %618 = shalt.err (!%p615_p8)
}
  0x37   : > { %461 = dma.hbm_to_vmem [thread:$0]  (!%p925_p12), %s921_s7, 128, %s929_s12, %s143_s3  }
  0x38   : > { %p180_p7 = scmp.lt.s32.totalorder %s799_s22, 5  ;;  %p1166_p9 = scmp.ge.s32.totalorder %s799_s22, 1 }
  0x39   : > { %s420_s5 = sadd.s32 4294967294, %s799_s22   ;;  %s36_s6 = sadd.s32 1, %s791_s20 }
  0x3a   : > { %p964_p13 = pnand %p1166_p9, %p180_p7  ;;  %s75_s8 = sadd.s32 1, %s767_s14 }
  0x3b   : > { %p38_p0 = scmp.ge.s32.totalorder %s36_s6, 2  ;;  %s105_s30 = sadd.s32 1, %s755_s11 }
  0x3c   : > { %p115_p2 = scmp.ne.s32.totalorder %s755_s11, %s751_s10  ;;  %p121_p4 = scmp.ne.s32.totalorder %s751_s10, %s747_s9 }
  0x3d   : > { %s1202_s6 = smov (%p38_p0, %s36_s6), 0  ;;  %s1204_s24 = smov (!%p38_p0, %s40_s24), %s795_s21 }
  0x3e   : > { %1168 = sst [smem:[#allocation14_spill]] %s1202_s6  ;;  %s72_s7 = ssub.s32 %s791_s20, %s1202_s6 }
  0x3f   : > { %p985_p12 = por %p911_p10, %p115_p2  ;;  %p42_p11 = scmp.ge.s32.totalorder %s1204_s24, 2 }
  0x40   : > { %p73_p1 = scmp.eq.s32.totalorder %s72_s7, 0  ;;  %p122_p3 = scmp.eq.s32.totalorder %s420_s5, 3 }
  0x41   : > { %s1169_s12 = scalar_select %p985_p12, 1, 0 }
  0x42   : > { %s161_s3 = sand.u32 1, %s767_s14   ;;  %s1206_s24 = smov (%p42_p11, %s1204_s24), 0 }
  0x43   : > { %1170 = sst [smem:[#allocation15_spill]] %s1206_s24  ;;  %s44_s4 = ssub.s32 %s795_s21, %s1206_s24 }
  0x44   : > { %s993_s26 = scalar_select %p73_p1, %s767_s14, %s75_s8  }
  0x45   : > { %p997_p5 = por %p122_p3, %p121_p4  ;;  %p47_p10 = scmp.eq.s32.totalorder %s44_s4, 0 }
  0x46   : > { %1171 = sst [smem:[#allocation16_spill]] %s993_s26  ;;  %s100_s29 = sor.u32 %s72_s7, %s44_s4 }
  0x47   : > { %s1172_s25 = scalar_select %p997_p5, 1, 0 }
  0x48   : > { %p103_p6 = scmp.eq.s32.totalorder %s100_s29, 0  ;;  %s1173_s0 = sadd.s32 1, %s779_s17 }
  0x49   : > { %s1004_s6 = scalar_select %p47_p10, %s779_s17, %s1173_s0  }
  0x4a   : > { %s1007_s5 = scalar_select %p103_p6, %s755_s11, %s105_s30  }
  0x4b   : > { %s425_s9 = sshll.u32 %s161_s3, 4  ;;  %s440_s22 = sshll.u32 %s791_s20, 8 }
  0x4c   : > { %s1013_s24 = scalar_lea.hbm %s1141_s1, %s440_s22  ;;  %s165_s21 = scalar_lea.vmem [#allocation5], %s425_s9 }
  0x4d   : > { %s172_s26 = sshll.u32 %s165_s21, 4  ;;  %s1017_s7 = scalar_lea.sflag [#allocation6], %s161_s3  ;;  %s1015_s26 = int_to_ptr.vmem [resolvable:$true] %s172_s26 }
  0x4e   : > { %s619_s0 = scalar_lea.hbm %s1013_s24, 256  ;;  %p1174_p7 = scmp.ne.s32.totalorder %s1165_s23, 0 }
  0x4f   : > { %p620_p8 = scmp.ne.s32.totalorder %s1013_s24, %s619_s0  ;;  %s624_s30 = scalar_lea.hbm %s1141_s1, 512 }
  0x50   : > { %p621_p9 = pneg %p1174_p7  ;;  %p625_p4 = scmp.lt.u32.totalorder %s1013_s24, %s1141_s1 }
  0x51   : > { %p626_p11 = scmp.lt.u32.totalorder %s624_s30, %s619_s0  ;;  %p628_p3 = scmp.lt.u32.totalorder %s619_s0, %s1013_s24 }
  0x52   : > { %p622_p0 = pnand %p621_p9, %p620_p8 }
  0x53   : > { %p627_p1 = por %p626_p11, %p625_p4 }
  0x54   : > { %p623_p2 = pneg %p622_p0 }
  0x55   : > { %p629_p10 = por %p628_p3, %p627_p1 }
  0x57   : > { %p630_p6 = pnand %p629_p10, %p623_p2 }
  0x59   : > { %633 = shalt.err (!%p630_p6)
}
  0x5a   : > { %s634_s9 = scalar_lea.vmem %s1015_s26, 256  ;;  %s802_s21 = smov [#allocation5]  }
  0x5b   : > { %p635_p8 = scmp.ne.s32.totalorder %s1015_s26, %s634_s9  ;;  %s639_s3 = sshll.u32 %s802_s21, 4  ;;  %s640_s3 = int_to_ptr.vmem [resolvable:$false] %s639_s3 }
  0x5c   : > { %s641_s8 = scalar_lea.vmem %s640_s3, 512  ;;  %p642_p12 = scmp.lt.s32.totalorder %s1015_s26, %s640_s3 }
  0x5d   : > { %p637_p0 = pnand %p635_p8, %p621_p9  ;;  %p643_p4 = scmp.lt.s32.totalorder %s641_s8, %s634_s9 }
  0x5f   : > { %p638_p5 = pneg %p637_p0  ;;  %p644_p11 = por %p643_p4, %p642_p12 }
  0x61   : > { %p645_p1 = pnand %p644_p11, %p638_p5 }
  0x63   : > { %648 = shalt.err (!%p645_p1)
}
  0x64   : > { %s803_s0 = smov 64   ;;  %s804_s2 = smov 4  }
  0x65   : > { %464 = dma.hbm_to_vmem [thread:$0]  (!%p1174_p7), %s1013_s24, 256, %s1015_s26, %s1017_s7, %s803_s0, %s803_s0, %s804_s2  }
  0x66   : > { %184 = sbr.rel (%p964_p13) target bundleno = 351 (0x15f), region = 28  ;;  %s186_s22 = sand.u32 (!%p964_p13), 1, %s775_s16  }
  0x67   : > { %s429_s30 = sshll.u32 (!%p964_p13), %s186_s22, 3  ;;  %s187_s4 = scalar_lea.sflag (!%p964_p13), [#allocation3], %s186_s22 }
  0x68   : > { %s190_s29 = scalar_lea.vmem (!%p964_p13), [#allocation2], %s429_s30  ;;  %p1175_p12 = scmp.ne.s32.totalorder (!%p964_p13), %s1160_s27, 0 }
  0x6d   : > { %734 = dma.done.wait (%p1175_p12), %s187_s4, 128  }
  0x6e   : > { %736 = vsyncadd (%p1175_p12), %s187_s4, 4294967168  ;;  %s195_s9 = sand.u32 1, %s763_s13   ;;  %p1176_p5 = scmp.ne.s32.totalorder %s1161_s28, 0 }
  0x6f   : > { %s430_s21 = sshll.u32 %s195_s9, 4  ;;  %s196_s23 = scalar_lea.sflag [#allocation6], %s195_s9 }
  0x70   : > { %s199_s24 = scalar_lea.vmem [#allocation5], %s430_s21 }
  0x71   : > { %738 = dma.done.wait (%p1176_p5), %s196_s23, 256  }
  0x72   : > { %740 = vsyncadd (%p1176_p5), %s196_s23, 4294967040  ;;  %v805_v0 = vmov 0.0   ;;  %vm806_vm0 = vmmov 0   ;;  %v587_v1 = vld [vmem:[%s199_s24] sm:$0xff]   ;;  %v588_v2 = vld [vmem:[%s199_s24 + $0x8] sm:$0xff]   ;;  %vm244_vm1 = vcmask 261120  }
  0x73   : > { %444 = vmatprep.subr.bf16.mxu0 %v805_v0  ;;  %448 = vmatprep.mubr.msk.bf16.mxu0 %vm806_vm0, %v805_v0  ;;  %v226_v3 = vld [vmem:[%s190_s29] sm:$0xff]  ;;  %s222_s27 = sand.u32 1, %s751_s10   ;;  %s436_s28 = sshll.u32 %s787_s19, 1  ;;  %vm289_vm2 = vcmask 257024  }
  0x74   : > { %445 = vmatpush3.bf16.msra.mxu0 %v587_v1  ;;  %v227_v4 = vpack.c.bf16 %v226_v3, %v226_v3  ;;  %s431_s15 = sshll.u32 %s222_s27, 2  ;;  %s304_s26 = sadd.s32 %s783_s18, %s436_s28 }
  0x75   : > { %446 = vmatprep.subr.bf16.mxu0 %v805_v0  ;;  %s437_s7 = sshll.u32 %s304_s26, 6  ;;  %s224_s3 = scalar_lea.vmem [#allocation7], %s431_s15 }
  0x76   : > { %s308_s8 = sshll.u32 %s224_s3, 4  ;;  %s1177_s22 = sld [smem:[#allocation18_spill]]  ;;  %s1065_s8 = int_to_ptr.vmem [resolvable:$true] %s308_s8 }
  0x77   : > { %s292_s18 = scalar_lea.sflag [#allocation4], %s222_s27  ;;  %s649_s19 = scalar_lea.vmem %s1065_s8, 64 }
  0x78   : > { %447 = vmatpush3.bf16.msra.mxu0 %v588_v2  ;;  %p650_p13 = scmp.ne.s32.totalorder %s1065_s8, %s649_s19  ;;  %p1179_p7 = scmp.ne.s32.totalorder %s1169_s12, 0 }
  0x79   : > { %s807_s29 = smov [#allocation7]  }
  0x7a   : > { %p651_p9 = pnand %p650_p13, %p1179_p7  ;;  %s653_s9 = sshll.u32 %s807_s29, 4  ;;  %s654_s9 = int_to_ptr.vmem [resolvable:$false] %s653_s9 }
  0x7b   : > { %449 = vmatmul.mubr.msk.bf16.vlgmr.msra.gmra.mrb[0].mxu0 %vm244_vm1, %v227_v4  ;;  %s655_s21 = scalar_lea.vmem %s654_s9, 128  ;;  %p656_p3 = scmp.lt.s32.totalorder %s1065_s8, %s654_s9 }
  0x7c   : > { %s1178_s30 = smov %s1177_s22  ;;  %s1063_s4 = scalar_lea.hbm %s1177_s22, %s437_s7 }
  0x7d   : > { %p652_p2 = pneg %p651_p9  ;;  %p657_p10 = scmp.lt.s32.totalorder %s655_s21, %s649_s19 }
  0x7f   : > { %p658_p6 = por %p657_p10, %p656_p3 }
  0x81   : > { %p659_p8 = pnand %p658_p6, %p652_p2 }
 0x14e   : > { %v282_v5 = vpop.f32.mrb[0].mxu0 }
 0x14f   : > { %v288_v6 = vpack.c.bf16 %v282_v5, %v282_v5  ;;  %v450_v7 = vpop.f32.mrb[1].mxu0 }
 0x150   : > { %v285_v8 = vpop.f32.mrb[2].mxu0 }
 0x151   : > { %v451_v9 = vpop.f32.mrb[3].mxu0  ;;  %290 = vst.msk [vmem:[%s224_s3] sm:$0xf] %vm289_vm2, %v288_v6 }
 0x152   : > { %662 = shalt.err (!%p659_p8)
}
 0x153   : > { %s663_s23 = scalar_lea.hbm %s1063_s4, 64  ;;  %s667_s15 = scalar_lea.hbm %s1178_s30, 256 }
 0x154   : > { %p664_p0 = scmp.ne.s32.totalorder %s1063_s4, %s663_s23  ;;  %p668_p1 = scmp.lt.u32.totalorder %s1063_s4, %s1178_s30 }
 0x155   : > { %p669_p12 = scmp.lt.u32.totalorder %s667_s15, %s663_s23  ;;  %p671_p13 = scmp.lt.u32.totalorder %s663_s23, %s1063_s4 }
 0x156   : > { %p665_p4 = pnand %p664_p0, %p1179_p7 }
 0x157   : > { %p670_p5 = por %p669_p12, %p668_p1 }
 0x158   : > { %p666_p11 = pneg %p665_p4 }
 0x159   : > { %p672_p9 = por %p671_p13, %p670_p5 }
 0x15b   : > { %p673_p2 = pnand %p672_p9, %p666_p11 }
 0x15d   : > { %676 = shalt.err (!%p673_p2)
}
 0x15e   : > { %456 = dma.vmem_to_hbm [thread:$0]  (%p1179_p7), %s1065_s8, 64, %s1063_s4, %s292_s18  }
 0x15f PF: > { %s1180_s7 = sld [smem:[#allocation13_spill]]  ;;  %s1181_s3 = sld [smem:[#allocation11_spill]] }
 0x160   : > { %p1182_p10 = scmp.ne.s32.totalorder %s1172_s25, 0 }
 0x165   : > { %p470_p3 = scmp.ge.s32.totalorder %s1180_s7, 2  ;;  %s320_s0 = sand.u32 1, %s1181_s3  }
 0x166   : > { %s321_s2 = scalar_lea.sflag [#allocation4], %s320_s0 }
 0x167   : > { %p466_p6 = pnand %p470_p3, %p1182_p10 }
 0x169   : > { %742 = dma.done.wait (!%p466_p6), %s321_s2, 64  }
 0x16a   : > { %744 = vsyncadd (!%p466_p6), %s321_s2, 4294967232  ;;  %s21_s22 = sadd.s32 1, %s1180_s7   ;;  %s1184_s8 = sld [smem:[#allocation16_spill]] }
 0x16b   : > { %p1093_p8 = scmp.ge.s32.totalorder %s21_s22, 6   ;;  %s1185_s25 = sld [smem:[#allocation12_spill]] }
 0x16c   : > { %s1186_s4 = sld [smem:[#allocation14_spill]]  ;;  %s1187_s21 = sld [smem:[#allocation15_spill]] }
 0x16d   : > { %s1189_s9 = smov %s751_s10  ;;  %s1190_s10 = smov %s755_s11 }
 0x16e   : > { %s1191_s11 = smov %s1007_s5  ;;  %s1192_s12 = smov %s763_s13 }
 0x16f   : > { %s1193_s13 = smov %s767_s14  ;;  %s1195_s15 = smov %s775_s16 }
 0x170   : > { %s1194_s14 = smov %s1184_s8  ;;  %s1196_s16 = smov %s779_s17 }
 0x171   : > { %s1197_s17 = smov %s1004_s6  ;;  %s1198_s18 = smov %s791_s20 }
 0x172   : > { %s1199_s19 = smov %s1185_s25  ;;  %s1200_s20 = smov %s1186_s4 }
 0x173   :  { %20 = sbr.rel (!%p1093_p8) target bundleno = 15 (0xf), region = 86 }
 0x17a   :  { %326 = vsyncpa [#allocation3], 1 }
 0x17b   :  { %328 = vsyncpa [#allocation3 + $0x1], 1 }
 0x17c   :  { %329 = vsyncpa [#allocation6], 1 }
 0x17d   :  { %331 = vsyncpa [#allocation6 + $0x1], 1 }
 0x17e   :  { %332 = vsyncpa [#allocation4], 1 }
 0x17f   :  { %334 = vsyncpa [#allocation4 + $0x1], 1 }

</bundles_post_ra>
